<compile_context>
chip_gen: v6e
topology: v6e:2x2x1
jax: 0.10.0
libtpu: 0.0.40
codegen_flags: <defaults>
</compile_context>

<pallas_src>
import functools

import jax
import jax.numpy as jnp
from jax.experimental import pallas as pl
from jax.experimental.pallas import tpu as pltpu


def _kld_kernel(p_ref, t_ref, o_ref, *, taf: float, fun: str):
    # p_ref, t_ref : (5, TR, 128) f32 blocks ; o_ref : (TR, 128) f32 block
    px = p_ref[0]
    py = p_ref[1]
    pw = p_ref[2]
    ph = p_ref[3]
    pa = p_ref[4]

    tx = t_ref[0]
    ty = t_ref[1]
    tw = t_ref[2]
    th = t_ref[3]
    ta = t_ref[4]

    dx = px - tx
    dy = py - ty
    da = pa - ta

    cos_t = jnp.cos(ta)
    sin_t = jnp.sin(ta)
    sin_da = jnp.sin(da)
    sin_da2 = sin_da * sin_da
    cos_da2 = 1.0 - sin_da2          # cos(da)^2, no extra transcendental

    t2sq = tw * tw
    t3sq = th * th
    p2sq = pw * pw
    p3sq = ph * ph

    # Two exact reciprocals replace the original 8 divides.
    inv_t2sq = 1.0 / t2sq
    inv_t3sq = 1.0 / t3sq

    u = dx * cos_t + dy * sin_t
    v = dy * cos_t - dx * sin_t

    term_xy = 2.0 * (u * u * inv_t2sq + v * v * inv_t3sq)
    term_wh = 0.5 * (
        sin_da2 * (p3sq * inv_t2sq + p2sq * inv_t3sq)
        + cos_da2 * (p3sq * inv_t3sq + p2sq * inv_t2sq)
    )
    # 0.5*(log(t3^2/p3^2) + log(t2^2/p2^2)) fused into a single log.
    term_log = -0.5 * jnp.log(p2sq * p3sq * inv_t2sq * inv_t3sq)

    kld = term_xy + term_wh + term_log - 1.0

    if fun == "sqrt":
        kld = jnp.sqrt(jnp.maximum(kld, 1e-07))
    elif fun == "log1p":
        kld = jnp.log1p(jnp.maximum(kld, 1e-07))
    # else: identity

    o_ref[...] = 1.0 - 1.0 / (taf + kld)


@functools.partial(jax.jit, static_argnames=("taf", "fun"))
def kld_loss_pallas(pred, target, taf: float = 1.0, fun: str = "sqrt"):
    """Pallas equivalent of KLDloss(taf, fun)(pred, target); returns (N,) f32."""
    pred = jnp.asarray(pred, jnp.float32).reshape(-1, 5)
    target = jnp.asarray(target, jnp.float32).reshape(-1, 5)
    n = pred.shape[0]

    lanes = 128
    max_tr = 512                               # rows per block (~1.3 MiB/input block)
    r = pl.cdiv(n, lanes)                      # sublane-rows needed
    if r <= max_tr:
        tr = max(8, ((r + 7) // 8) * 8)        # single block, (8,128)-aligned
    else:
        tr = max_tr
    r_pad = pl.cdiv(r, tr) * tr
    n_pad = r_pad * lanes
    pad = n_pad - n

    if pad:
        # Pad all 5 components of both tensors with 1.0: padded boxes have
        # pred == target == (1,1,1,1,1) so every term stays finite; the padded
        # outputs are sliced away below.
        pred = jnp.pad(pred, ((0, pad), (0, 0)), constant_values=1.0)
        target = jnp.pad(target, ((0, pad), (0, 0)), constant_values=1.0)

    # (5, R, 128): component on the leading axis, box index dense over
    # (sublane, lane).  Single transpose+reshape, fused by XLA under jit.
    p = pred.T.reshape(5, r_pad, lanes)
    t = target.T.reshape(5, r_pad, lanes)

    grid = (r_pad // tr,)
    out = pl.pallas_call(
        functools.partial(_kld_kernel, taf=float(taf), fun=fun),
        out_shape=jax.ShapeDtypeStruct((r_pad, lanes), jnp.float32),
        grid_spec=pltpu.PrefetchScalarGridSpec(
            num_scalar_prefetch=0,
            grid=grid,
            in_specs=[
                pl.BlockSpec((5, tr, lanes), lambda i: (0, i, 0)),
                pl.BlockSpec((5, tr, lanes), lambda i: (0, i, 0)),
            ],
            out_specs=pl.BlockSpec((tr, lanes), lambda i: (i, 0)),
        ),
        compiler_params=pltpu.CompilerParams(
            dimension_semantics=("parallel",)
        ),
    )(p, t)

    return out.reshape(-1)[:n]


def _kld_loss_ref(pred, target, taf=1.0, fun="sqrt"):
    """Pure-JAX reference mirroring the PyTorch forward, for sanity check."""
    pred = jnp.asarray(pred, jnp.float32).reshape(-1, 5)
    target = jnp.asarray(target, jnp.float32).reshape(-1, 5)
    dx = pred[:, 0] - target[:, 0]
    dy = pred[:, 1] - target[:, 1]
    ta = target[:, 4]
    da = pred[:, 4] - ta
    kld = 0.5 * (
        4 * (dx * jnp.cos(ta) + dy * jnp.sin(ta)) ** 2 / target[:, 2] ** 2
        + 4 * (dy * jnp.cos(ta) - dx * jnp.sin(ta)) ** 2 / target[:, 3] ** 2
    ) + 0.5 * (
        pred[:, 3] ** 2 / target[:, 2] ** 2 * jnp.sin(da) ** 2
        + pred[:, 2] ** 2 / target[:, 3] ** 2 * jnp.sin(da) ** 2
        + pred[:, 3] ** 2 / target[:, 3] ** 2 * jnp.cos(da) ** 2
        + pred[:, 2] ** 2 / target[:, 2] ** 2 * jnp.cos(da) ** 2
    ) + 0.5 * (
        jnp.log(target[:, 3] ** 2 / pred[:, 3] ** 2)
        + jnp.log(target[:, 2] ** 2 / pred[:, 2] ** 2)
    ) - 1.0
    if fun == "sqrt":
        kld = jnp.sqrt(jnp.maximum(kld, 1e-07))
    elif fun == "log1p":
        kld = jnp.log1p(jnp.maximum(kld, 1e-07))
    return 1.0 - 1.0 / (taf + kld)


if __name__ == "__main__":
    key = jax.random.PRNGKey(0)
    k1, k2, k3, k4, k5, k6 = jax.random.split(key, 6)

    # Inputs of shape (batch=2, boxes=8, 5): [x, y, w, h, angle]
    B, M = 2, 8
    pred_xy = jax.random.normal(k1, (B, M, 2), jnp.float32) * 2.0
    pred_wh = jax.random.uniform(k2, (B, M, 2), jnp.float32, 0.5, 2.0)
    pred_a = jax.random.uniform(k3, (B, M, 1), jnp.float32, -1.0, 1.0)
    tgt_xy = jax.random.normal(k4, (B, M, 2), jnp.float32) * 2.0
    tgt_wh = jax.random.uniform(k5, (B, M, 2), jnp.float32, 0.5, 2.0)
    tgt_a = jax.random.uniform(k6, (B, M, 1), jnp.float32, -1.0, 1.0)

    pred = jnp.concatenate([pred_xy, pred_wh, pred_a], axis=-1)   # (2, 8, 5)
    target = jnp.concatenate([tgt_xy, tgt_wh, tgt_a], axis=-1)    # (2, 8, 5)

    out = kld_loss_pallas(pred, target, taf=1.0, fun="sqrt")
    out = jax.block_until_ready(out)

    ref = _kld_loss_ref(pred, target, taf=1.0, fun="sqrt")
    assert out.shape == (B * M,)
    assert jnp.allclose(out, ref, rtol=1e-5, atol=1e-5)

    print("KERNEL_OK")
</pallas_src>

<mosaic_0001>
module attributes {stable_mosaic.version = 11 : i64} {
  func.func @_kld_kernel(%arg0: i32, %arg1: memref<5x8x128xf32, #tpu.memory_space<vmem>>, %arg2: memref<5x8x128xf32, #tpu.memory_space<vmem>>, %arg3: memref<8x128xf32, #tpu.memory_space<vmem>>) attributes {dimension_semantics = [#tpu.dimension_semantics<parallel>], iteration_bounds = array<i64: 1>, scalar_prefetch = 0 : i64, scratch_operands = 0 : i64, tpu.core_type = #tpu.core_type<tc>, window_params = [{transform_indices = @transform_0, window_bounds = array<i64: 5, 8, 128>}, {transform_indices = @transform_1, window_bounds = array<i64: 5, 8, 128>}, {transform_indices = @transform_2, window_bounds = array<i64: 8, 128>}]} {
    %c0 = arith.constant 0 : index
    %c0_0 = arith.constant 0 : index
    %c0_1 = arith.constant 0 : index
    %0 = vector.load %arg1[%c0, %c0_0, %c0_1] : memref<5x8x128xf32, #tpu.memory_space<vmem>>, vector<1x8x128xf32>
    %1 = vector.shape_cast %0 : vector<1x8x128xf32> to vector<8x128xf32>
    %c1 = arith.constant 1 : index
    %c0_2 = arith.constant 0 : index
    %c0_3 = arith.constant 0 : index
    %2 = vector.load %arg1[%c1, %c0_2, %c0_3] : memref<5x8x128xf32, #tpu.memory_space<vmem>>, vector<1x8x128xf32>
    %3 = vector.shape_cast %2 : vector<1x8x128xf32> to vector<8x128xf32>
    %c2 = arith.constant 2 : index
    %c0_4 = arith.constant 0 : index
    %c0_5 = arith.constant 0 : index
    %4 = vector.load %arg1[%c2, %c0_4, %c0_5] : memref<5x8x128xf32, #tpu.memory_space<vmem>>, vector<1x8x128xf32>
    %5 = vector.shape_cast %4 : vector<1x8x128xf32> to vector<8x128xf32>
    %c3 = arith.constant 3 : index
    %c0_6 = arith.constant 0 : index
    %c0_7 = arith.constant 0 : index
    %6 = vector.load %arg1[%c3, %c0_6, %c0_7] : memref<5x8x128xf32, #tpu.memory_space<vmem>>, vector<1x8x128xf32>
    %7 = vector.shape_cast %6 : vector<1x8x128xf32> to vector<8x128xf32>
    %c4 = arith.constant 4 : index
    %c0_8 = arith.constant 0 : index
    %c0_9 = arith.constant 0 : index
    %8 = vector.load %arg1[%c4, %c0_8, %c0_9] : memref<5x8x128xf32, #tpu.memory_space<vmem>>, vector<1x8x128xf32>
    %9 = vector.shape_cast %8 : vector<1x8x128xf32> to vector<8x128xf32>
    %c0_10 = arith.constant 0 : index
    %c0_11 = arith.constant 0 : index
    %c0_12 = arith.constant 0 : index
    %10 = vector.load %arg2[%c0_10, %c0_11, %c0_12] : memref<5x8x128xf32, #tpu.memory_space<vmem>>, vector<1x8x128xf32>
    %11 = vector.shape_cast %10 : vector<1x8x128xf32> to vector<8x128xf32>
    %c1_13 = arith.constant 1 : index
    %c0_14 = arith.constant 0 : index
    %c0_15 = arith.constant 0 : index
    %12 = vector.load %arg2[%c1_13, %c0_14, %c0_15] : memref<5x8x128xf32, #tpu.memory_space<vmem>>, vector<1x8x128xf32>
    %13 = vector.shape_cast %12 : vector<1x8x128xf32> to vector<8x128xf32>
    %c2_16 = arith.constant 2 : index
    %c0_17 = arith.constant 0 : index
    %c0_18 = arith.constant 0 : index
    %14 = vector.load %arg2[%c2_16, %c0_17, %c0_18] : memref<5x8x128xf32, #tpu.memory_space<vmem>>, vector<1x8x128xf32>
    %15 = vector.shape_cast %14 : vector<1x8x128xf32> to vector<8x128xf32>
    %c3_19 = arith.constant 3 : index
    %c0_20 = arith.constant 0 : index
    %c0_21 = arith.constant 0 : index
    %16 = vector.load %arg2[%c3_19, %c0_20, %c0_21] : memref<5x8x128xf32, #tpu.memory_space<vmem>>, vector<1x8x128xf32>
    %17 = vector.shape_cast %16 : vector<1x8x128xf32> to vector<8x128xf32>
    %c4_22 = arith.constant 4 : index
    %c0_23 = arith.constant 0 : index
    %c0_24 = arith.constant 0 : index
    %18 = vector.load %arg2[%c4_22, %c0_23, %c0_24] : memref<5x8x128xf32, #tpu.memory_space<vmem>>, vector<1x8x128xf32>
    %19 = vector.shape_cast %18 : vector<1x8x128xf32> to vector<8x128xf32>
    %20 = arith.subf %1, %11 : vector<8x128xf32>
    %21 = arith.subf %3, %13 : vector<8x128xf32>
    %22 = arith.subf %9, %19 : vector<8x128xf32>
    %23 = math.cos %19 : vector<8x128xf32>
    %24 = math.sin %19 : vector<8x128xf32>
    %25 = math.sin %22 : vector<8x128xf32>
    %26 = arith.mulf %25, %25 : vector<8x128xf32>
    %cst = arith.constant 1.000000e+00 : f32
    %27 = vector.broadcast %cst : f32 to vector<8x128xf32>
    %28 = arith.subf %27, %26 : vector<8x128xf32>
    %29 = arith.mulf %15, %15 : vector<8x128xf32>
    %30 = arith.mulf %17, %17 : vector<8x128xf32>
    %31 = arith.mulf %5, %5 : vector<8x128xf32>
    %32 = arith.mulf %7, %7 : vector<8x128xf32>
    %cst_25 = arith.constant 1.000000e+00 : f32
    %33 = vector.broadcast %cst_25 : f32 to vector<8x128xf32>
    %34 = arith.divf %33, %29 : vector<8x128xf32>
    %cst_26 = arith.constant 1.000000e+00 : f32
    %35 = vector.broadcast %cst_26 : f32 to vector<8x128xf32>
    %36 = arith.divf %35, %30 : vector<8x128xf32>
    %37 = arith.mulf %20, %23 : vector<8x128xf32>
    %38 = arith.mulf %21, %24 : vector<8x128xf32>
    %39 = arith.addf %37, %38 : vector<8x128xf32>
    %40 = arith.mulf %21, %23 : vector<8x128xf32>
    %41 = arith.mulf %20, %24 : vector<8x128xf32>
    %42 = arith.subf %40, %41 : vector<8x128xf32>
    %43 = arith.mulf %39, %39 : vector<8x128xf32>
    %44 = arith.mulf %43, %34 : vector<8x128xf32>
    %45 = arith.mulf %42, %42 : vector<8x128xf32>
    %46 = arith.mulf %45, %36 : vector<8x128xf32>
    %47 = arith.addf %44, %46 : vector<8x128xf32>
    %cst_27 = arith.constant 2.000000e+00 : f32
    %48 = vector.broadcast %cst_27 : f32 to vector<8x128xf32>
    %49 = arith.mulf %48, %47 : vector<8x128xf32>
    %50 = arith.mulf %32, %34 : vector<8x128xf32>
    %51 = arith.mulf %31, %36 : vector<8x128xf32>
    %52 = arith.addf %50, %51 : vector<8x128xf32>
    %53 = arith.mulf %26, %52 : vector<8x128xf32>
    %54 = arith.mulf %32, %36 : vector<8x128xf32>
    %55 = arith.mulf %31, %34 : vector<8x128xf32>
    %56 = arith.addf %54, %55 : vector<8x128xf32>
    %57 = arith.mulf %28, %56 : vector<8x128xf32>
    %58 = arith.addf %53, %57 : vector<8x128xf32>
    %cst_28 = arith.constant 5.000000e-01 : f32
    %59 = vector.broadcast %cst_28 : f32 to vector<8x128xf32>
    %60 = arith.mulf %59, %58 : vector<8x128xf32>
    %61 = arith.mulf %31, %32 : vector<8x128xf32>
    %62 = arith.mulf %61, %34 : vector<8x128xf32>
    %63 = arith.mulf %62, %36 : vector<8x128xf32>
    %64 = math.log %63 : vector<8x128xf32>
    %cst_29 = arith.constant -5.000000e-01 : f32
    %65 = vector.broadcast %cst_29 : f32 to vector<8x128xf32>
    %66 = arith.mulf %65, %64 : vector<8x128xf32>
    %67 = arith.addf %49, %60 : vector<8x128xf32>
    %68 = arith.addf %67, %66 : vector<8x128xf32>
    %cst_30 = arith.constant 1.000000e+00 : f32
    %69 = vector.broadcast %cst_30 : f32 to vector<8x128xf32>
    %70 = arith.subf %68, %69 : vector<8x128xf32>
    %cst_31 = arith.constant 1.000000e-07 : f32
    %71 = vector.broadcast %cst_31 : f32 to vector<8x128xf32>
    %72 = arith.maximumf %70, %71 : vector<8x128xf32>
    %73 = math.sqrt %72 : vector<8x128xf32>
    %cst_32 = arith.constant 1.000000e+00 : f32
    %74 = vector.broadcast %cst_32 : f32 to vector<8x128xf32>
    %75 = arith.addf %74, %73 : vector<8x128xf32>
    %cst_33 = arith.constant 1.000000e+00 : f32
    %76 = vector.broadcast %cst_33 : f32 to vector<8x128xf32>
    %77 = arith.divf %76, %75 : vector<8x128xf32>
    %cst_34 = arith.constant 1.000000e+00 : f32
    %78 = vector.broadcast %cst_34 : f32 to vector<8x128xf32>
    %79 = arith.subf %78, %77 : vector<8x128xf32>
    %c0_35 = arith.constant 0 : index
    %c0_36 = arith.constant 0 : index
    %80 = vector.load %arg3[%c0_35, %c0_36] : memref<8x128xf32, #tpu.memory_space<vmem>>, vector<8x128xf32>
    tpu.vector_store %arg3[%c0_35, %c0_36], %79 {strides = array<i32>} : memref<8x128xf32, #tpu.memory_space<vmem>>, vector<8x128xf32>,
    return
  }
  func.func @transform_0(%arg0: i32) -> (i32, i32, i32) {
    %c0_i32 = arith.constant 0 : i32
    %c0_i32_0 = arith.constant 0 : i32
    %c0_i32_1 = arith.constant 0 : i32
    return %c0_i32, %arg0, %c0_i32_0 : i32, i32, i32
  }
  func.func @transform_1(%arg0: i32) -> (i32, i32, i32) {
    %c0_i32 = arith.constant 0 : i32
    %c0_i32_0 = arith.constant 0 : i32
    %c0_i32_1 = arith.constant 0 : i32
    return %c0_i32, %arg0, %c0_i32_0 : i32, i32, i32
  }
  func.func @transform_2(%arg0: i32) -> (i32, i32) {
    %c0_i32 = arith.constant 0 : i32
    %c0_i32_0 = arith.constant 0 : i32
    return %arg0, %c0_i32 : i32, i32
  }
}

</mosaic_0001>

<bundles_post_ra>
// kernel: kld_loss_pallas.1
= control target key start
LH: loop header
LB: loop body
LE: loop exit
PB: predicated region body
PF: predicated region fallthrough
CT: control target
= control target key end

     0   :  { %v454_v28 = vmov 683565275   ;;  %v455_v30 = vmov 2475754826   ;;  %v456_v32 = vmov 2131351028   ;;  %s620_s0 = inlined_call_operand.vmem [shape: f32[5,8,128], index: 0, kind: input, shape index: {}]   ;;  %s621_s1 = inlined_call_operand.vmem [shape: f32[5,8,128], index: 1, kind: input, shape index: {}]   ;;  %s622_s2 = inlined_call_operand.vmem [shape: f32[8,128], index: 2, kind: output, shape index: {}]  }
   0x1   :  { %v11_v0 = vld [vmem:[%s620_s0] sm:$0xff]  ;;  %v401_v1 = vld [vmem:[%s620_s0 + $0x8] sm:$0xff]  ;;  %v457_v34 = vmov 2102212464   ;;  %v458_v36 = vmov 920167782  }
   0x2   :  { %v404_v2 = vld [vmem:[%s620_s0 + $0x20] sm:$0xff]  ;;  %v405_v4 = vld [vmem:[%s621_s1 + $0x8] sm:$0xff]  ;;  %v459_v43 = vmov 1326507024  }
   0x3   :  { %v20_v3 = vld [vmem:[%s621_s1] sm:$0xff]  ;;  %v497_v7 = vsub.f32 %v401_v1, %v405_v4 }
   0x4   :  { %v490_v5 = vsub.f32 %v11_v0, %v20_v3  ;;  %v495_v6 = vld [vmem:[%s621_s1 + $0x20] sm:$0xff] }
   0x5   :  { %v500_v8 = vsub.f32 %v404_v2, %v495_v6  ;;  %v32_v9 = vand.u32 2147483647, %v495_v6  ;;  %v35_v10 = vand.u32 2139095040, %v495_v6  ;;  %vm34_vm14 = vcmp.lt.s32.totalorder %v495_v6, 0 }
   0x7   :  { %v36_v11 = vshrl.u32 %v35_v10, 23  ;;  %v39_v12 = vand.u32 8388607, %v32_v9  ;;  %v239_v13 = vand.u32 2147483647, %v500_v8  ;;  %v242_v14 = vand.u32 2139095040, %v500_v8 }
   0x8   :  { %vm568_vm15 = vcmp.le.f32.partialorder %v32_v9, 0.7853982 }
   0x9   :  { %v409_v15 = vadd.s32 4294967169, %v36_v11  ;;  %v243_v16 = vshrl.u32 %v242_v14, 23  ;;  %v40_v18 = vor.u32 8388608, %v39_v12  ;;  %v510_v20 = vand.u32 8388607, %v239_v13 }
   0xb   :  { %v42_v17 = vadd.s32 1, %v409_v15  ;;  %v417_v19 = vadd.s32 4294967169, %v243_v16  ;;  %v512_v25 = vshll.u32 %v40_v18, 8  ;;  %v247_v26 = vor.u32 8388608, %v510_v20 }
   0xd   :  { %vm43_vm0 = vcmp.gt.s32.totalorder %v42_v17, 0  ;;  %v249_v22 = vadd.s32 1, %v417_v19 }
   0xe   :  { %v44_v21 = vsel %vm43_vm0, %v42_v17, 0  ;;  %vm241_vm0 = vcmp.lt.s32.totalorder %v500_v8, 0 }
   0xf   :  { %v45_v23 = vshrl.u32 %v44_v21, 5  ;;  %v46_v24 = vand.u32 31, %v44_v21  ;;  %vm250_vm1 = vcmp.gt.s32.totalorder %v249_v22, 0 }
  0x10   :  { %v251_v48 = vsel %vm250_vm1, %v249_v22, 0  ;;  %vm597_vm1 = vcmp.le.f32.partialorder %v239_v13, 0.7853982 }
  0x11   :  { %v47_v27 = vsub.s32 32, %v46_v24  ;;  %v49_v29 = vshll.u32 %v454_v28, %v46_v24  ;;  %v52_v31 = vshll.u32 %v455_v30, %v46_v24  ;;  %v55_v33 = vshll.u32 %v456_v32, %v46_v24 }
  0x12   :  { %v58_v35 = vshll.u32 %v457_v34, %v46_v24  ;;  %v61_v37 = vshll.u32 %v458_v36, %v46_v24  ;;  %vm64_vm2 = vcmp.lt.s32.totalorder %v45_v23, 1  ;;  %vm65_vm3 = vcmp.lt.s32.totalorder %v45_v23, 2 }
  0x13   :  { %v48_v38 = vshrl.u32 %v454_v28, %v47_v27  ;;  %v50_v39 = vshrl.u32 %v455_v30, %v47_v27  ;;  %v53_v40 = vshrl.u32 %v456_v32, %v47_v27  ;;  %v56_v41 = vshrl.u32 %v457_v34, %v47_v27 }
  0x14   :  { %v59_v42 = vshrl.u32 %v458_v36, %v47_v27  ;;  %v62_v44 = vshrl.u32 %v459_v43, %v47_v27  ;;  %vm66_vm4 = vcmp.lt.s32.totalorder %v45_v23, 3  ;;  %vm67_vm5 = vcmp.lt.s32.totalorder %v45_v23, 4 }
  0x15   :  { %v51_v45 = vor.u32 %v50_v39, %v49_v29  ;;  %v54_v46 = vor.u32 %v53_v40, %v52_v31  ;;  %v57_v47 = vor.u32 %v56_v41, %v55_v33  ;;  %v252_v51 = vshrl.u32 %v251_v48, 5 }
  0x16   :  { %v60_v49 = vor.u32 %v59_v42, %v58_v35  ;;  %v63_v50 = vor.u32 %v62_v44, %v61_v37  ;;  %v253_v52 = vand.u32 31, %v251_v48 }
  0x17   :  { %v68_v53 = vsel %vm64_vm2, %v48_v38, %v51_v45  ;;  %v69_v54 = vsel %vm67_vm5, %v57_v47, 2102212464  ;;  %v72_v55 = vsel %vm64_vm2, %v51_v45, %v54_v46  ;;  %v76_v56 = vsel %vm64_vm2, %v54_v46, %v57_v47 }
  0x18   :  { %v70_v57 = vsel %vm66_vm4, %v54_v46, %v69_v54  ;;  %v73_v58 = vsel %vm67_vm5, %v60_v49, 920167782  ;;  %v77_v59 = vsel %vm67_vm5, %v63_v50, 1326507024  ;;  %v254_v60 = vsub.s32 32, %v253_v52 }
  0x19   :  { %v71_v61 = vsel %vm65_vm3, %v68_v53, %v70_v57  ;;  %v74_v62 = vsel %vm66_vm4, %v57_v47, %v73_v58  ;;  %v78_v63 = vsel %vm66_vm4, %v60_v49, %v77_v59  ;;  %v256_v0 = vshll.u32 %v454_v28, %v253_v52 }
  0x1a   :  { %v75_v1 = vsel %vm65_vm3, %v72_v55, %v74_v62  ;;  %v79_v2 = vsel %vm65_vm3, %v76_v56, %v78_v63  ;;  %v87_v3 = vmul.u32 %v512_v25, %v71_v61  ;;  %v255_v4 = vshrl.u32 %v454_v28, %v254_v60 }
  0x1b   :  { %v527_v10 = vmul.u32.u64.low %v512_v25, %v79_v2  ;;  %v528_v11 = vmul.u32.u64.high %v512_v25, %v79_v2, %v527_v10  ;;  %v531_v12 = vmul.u32.u64.low %v512_v25, %v75_v1  ;;  %v532_v14 = vmul.u32.u64.high %v512_v25, %v75_v1, %v531_v12 }
  0x1c   :  { %v257_v15 = vshrl.u32 %v455_v30, %v254_v60  ;;  %v259_v16 = vshll.u32 %v455_v30, %v253_v52  ;;  %v260_v17 = vshrl.u32 %v456_v32, %v254_v60  ;;  %v262_v18 = vshll.u32 %v456_v32, %v253_v52 }
  0x1d   :  { %v263_v19 = vshrl.u32 %v457_v34, %v254_v60  ;;  %v265_v21 = vshll.u32 %v457_v34, %v253_v52  ;;  %v266_v22 = vshrl.u32 %v458_v36, %v254_v60  ;;  %v268_v23 = vshll.u32 %v458_v36, %v253_v52 }
  0x1e   :  { %v258_v24 = vor.u32 %v257_v15, %v256_v0  ;;  %v261_v27 = vor.u32 %v260_v17, %v259_v16  ;;  %v269_v29 = vshrl.u32 %v459_v43, %v254_v60  ;;  %vm271_vm6 = vcmp.lt.s32.totalorder %v252_v51, 1  ;;  %v406_v17 = vld [vmem:[%s621_s1 + $0x10] sm:$0xff] }
  0x1f   :  { %vm89_vm7 = vc.u32 %v528_v11, %v531_v12  ;;  %v90_v28 = vadd.s32 1, %v532_v14  ;;  %v264_v31 = vor.u32 %v263_v19, %v262_v18  ;;  %v287_v25 = vshll.u32 %v247_v26, 8 }
  0x20   :  { %v267_v33 = vor.u32 %v266_v22, %v265_v21  ;;  %v270_v30 = vor.u32 %v269_v29, %v268_v23  ;;  %vm272_vm8 = vcmp.lt.s32.totalorder %v252_v51, 2  ;;  %vm273_vm9 = vcmp.lt.s32.totalorder %v252_v51, 3 }
  0x21   :  { %v91_v32 = vsel %vm89_vm7, %v90_v28, %v532_v14  ;;  %vm274_vm10 = vcmp.lt.s32.totalorder %v252_v51, 4  ;;  %v275_v34 = vsel %vm271_vm6, %v255_v4, %v258_v24  ;;  %v279_v35 = vsel %vm271_vm6, %v258_v24, %v261_v27 }
  0x22   :  { %v92_v36 = vadd.s32 %v91_v32, %v87_v3  ;;  %v276_v37 = vsel %vm274_vm10, %v264_v31, 2102212464  ;;  %v280_v38 = vsel %vm274_vm10, %v267_v33, 920167782  ;;  %v283_v39 = vsel %vm271_vm6, %v261_v27, %v264_v31 }
  0x23   :  { %v277_v40 = vsel %vm273_vm9, %v261_v27, %v276_v37  ;;  %v281_v41 = vsel %vm273_vm9, %v264_v31, %v280_v38  ;;  %v284_v20 = vsel %vm274_vm10, %v270_v30, 1326507024  ;;  %v88_v0 = vadd.s32 %v531_v12, %v528_v11  ;;  %v407_v11 = vld [vmem:[%s621_s1 + $0x18] sm:$0xff] }
  0x24   :  { %v93_v26 = vadd.s32 536870912, %v92_v36  ;;  %v282_v42 = vsel %vm272_vm8, %v279_v35, %v281_v41  ;;  %v285_v43 = vsel %vm273_vm9, %v267_v33, %v284_v20  ;;  %v278_v44 = vsel %vm272_vm8, %v275_v34, %v277_v40  ;;  %v402_v41 = vld [vmem:[%s620_s0 + $0x10] sm:$0xff]  ;;  %v403_v20 = vld [vmem:[%s620_s0 + $0x18] sm:$0xff] }
  0x25   :  { %v286_v45 = vsel %vm272_vm8, %v283_v39, %v285_v43  ;;  %v545_v46 = vmul.u32.u64.low %v287_v25, %v282_v42  ;;  %v546_v47 = vmul.u32.u64.high %v287_v25, %v282_v42, %v545_v46  ;;  %v294_v53 = vmul.u32 %v287_v25, %v278_v44 }
  0x26   :  { %v94_v48 = vshrl.u32 %v93_v26, 30  ;;  %v548_v49 = vmul.u32.u64.low %v287_v25, %v286_v45  ;;  %v549_v50 = vmul.u32.u64.high %v287_v25, %v286_v45, %v548_v49  ;;  %v345_v24 = vmul.f32 %v406_v17, %v406_v17 }
  0x27   :  { %v297_v54 = vadd.s32 1, %v546_v47  ;;  %v346_v31 = vmul.f32 %v407_v11, %v407_v11  ;;  %v589_v49 = vmul.f32 %v403_v20, %v403_v20  ;;  %vm124_vm8 = vweird.f32 %v495_v6 }
  0x28   :  { %v95_v52 = vshll.u32 %v94_v48, 30  ;;  %vm296_vm11 = vc.u32 %v549_v50, %v545_v46  ;;  %v295_v28 = vadd.s32 %v545_v46, %v549_v50  ;;  %436 = vrcp.f32 %v345_v24 }
  0x29   :  { %v298_v56 = vsel %vm296_vm11, %v297_v54, %v546_v47  ;;  %v118_v30 = vsub.s32 4, %v94_v48  ;;  %438 = vrcp.f32 %v346_v31  ;;  %v587_v47 = vmul.f32 %v402_v41, %v402_v41 }
  0x2a   :  { %v96_v55 = vsub.s32 %v92_v36, %v95_v52  ;;  %v299_v58 = vadd.s32 %v298_v56, %v294_v53 }
  0x2b   :  { %v119_v9 = vsel %vm34_vm14, %v118_v30, %v94_v48  ;;  %v375_v54 = vmul.f32 %v589_v49, %v587_v47 }
  0x2c   :  { %v98_v57 = vsub.s32 0, %v96_v55  ;;  %v300_v59 = vadd.s32 536870912, %v299_v58  ;;  %v121_v46 = vsel %vm568_vm15, 0, %v119_v9 }
  0x2d   :  { %v228_v52 = vadd.s32 3, %v121_v46 }
  0x2e   :  { %v410_v51 = vmin.u32 %v98_v57, %v96_v55  ;;  %v554_v61 = vshrl.u32 %v300_v59, 30 }
  0x30   :  { %v100_v60 = vclz %v410_v51  ;;  %v302_v63 = vshll.u32 %v554_v61, 30  ;;  %v325_v53 = vsub.s32 4, %v554_v61  ;;  %v229_v51 = vand.u32 3, %v228_v52 }
  0x32   :  { %v411_v62 = vadd.s32 4294967294, %v100_v60  ;;  %v303_v2 = vsub.s32 %v299_v58, %v302_v63  ;;  %v125_v58 = vand.u32 3, %v121_v46  ;;  %v326_v60 = vsel %vm241_vm0, %v325_v53, %v554_v61 }
  0x33   :  { %vm234_vm3 = vcmp.eq.s32.totalorder %v229_v51, 2  ;;  %vm231_vm5 = vcmp.eq.s32.totalorder %v229_v51, 0  ;;  %vm230_vm7 = vcmp.lt.s32.totalorder %v229_v51, 2 }
  0x34   :  { %vm412_vm12 = vcmp.lt.s32.totalorder %v411_v62, 0  ;;  %v305_v14 = vsub.s32 0, %v303_v2  ;;  %vm130_vm2 = vcmp.eq.s32.totalorder %v125_v58, 2  ;;  %vm127_vm4 = vcmp.eq.s32.totalorder %v125_v58, 0 }
  0x35   :  { %v103_v1 = vsel %vm412_vm12, 0, %v411_v62  ;;  %vm126_vm6 = vcmp.lt.s32.totalorder %v125_v58, 2  ;;  %vm331_vm12 = vweird.f32 %v500_v8 }
  0x36   :  { %v104_v3 = vsub.s32 32, %v103_v1  ;;  %v105_v4 = vshll.u32 %v96_v55, %v103_v1  ;;  %v108_v10 = vsub.s32 4294967266, %v103_v1  ;;  %v418_v18 = vmin.u32 %v305_v14, %v303_v2  ;;  %v437_v55 = vpop.eup %436 }
  0x37   :  { %v376_v63 = vmul.f32 %v437_v55, %v375_v54  ;;  %v328_v1 = vsel %vm597_vm1, 0, %v326_v60 }
  0x38   :  { %v106_v15 = vshrl.u32 %v88_v0, %v104_v3  ;;  %v109_v16 = vadd.s32 127, %v108_v10  ;;  %v307_v22 = vclz %v418_v18  ;;  %v439_v0 = vpop.eup %438  ;;  %v332_v10 = vadd.s32 3, %v328_v1 }
  0x3a   :  { %v107_v19 = vor.u32 %v106_v15, %v105_v4  ;;  %v110_v21 = vshll.u32 %v109_v16, 23  ;;  %v419_v27 = vadd.s32 4294967294, %v307_v22  ;;  %v377_v4 = vmul.f32 %v439_v0, %v376_v63 }
  0x3b   :  { %v333_v11 = vand.u32 3, %v332_v10 }
  0x3c   :  { %v111_v12 = vor.u32 4788187, %v110_v21  ;;  %v114_v23 = vcvt.s32.f32 %v107_v19  ;;  %vm420_vm13 = vcmp.lt.s32.totalorder %v419_v27, 0 }
  0x3d   :  { %v310_v33 = vsel %vm420_vm13, 0, %v419_v27  ;;  %vm338_vm9 = vcmp.eq.s32.totalorder %v333_v11, 2  ;;  %vm335_vm10 = vcmp.eq.s32.totalorder %v333_v11, 0  ;;  %vm334_vm11 = vcmp.lt.s32.totalorder %v333_v11, 2 }
  0x3e   :  { %v112_v29 = vand.u32 2147483647, %v111_v12  ;;  %v311_v32 = vsub.s32 32, %v310_v33  ;;  %v312_v34 = vshll.u32 %v303_v2, %v310_v33  ;;  %v315_v35 = vsub.s32 4294967266, %v310_v33 }
  0x40   :  { %v115_v25 = vmul.f32 %v114_v23, %v112_v29  ;;  %v313_v38 = vshrl.u32 %v295_v28, %v311_v32  ;;  %v316_v39 = vadd.s32 127, %v315_v35  ;;  %v365_v32 = vmul.f32 %v437_v55, %v589_v49 }
  0x42   :  { %v116_v37 = vxor.u32 2147483648, %v115_v25  ;;  %v314_v42 = vor.u32 %v313_v38, %v312_v34  ;;  %v317_v43 = vshll.u32 %v316_v39, 23  ;;  %v366_v34 = vmul.f32 %v439_v0, %v587_v47 }
  0x43   :  { %v370_v38 = vmul.f32 %v437_v55, %v587_v47 }
  0x44   :  { %v117_v40 = vsel %vm34_vm14, %v116_v37, %v115_v25  ;;  %v318_v44 = vor.u32 4788187, %v317_v43  ;;  %v321_v45 = vcvt.s32.f32 %v314_v42  ;;  %v367_v20 = vadd.f32 %v366_v34, %v365_v32 }
  0x45   :  { %v120_v26 = vsel %vm568_vm15, %v495_v6, %v117_v40 }
  0x46   :  { %440 = vcosq.f32 %v120_v26  ;;  %v319_v50 = vand.u32 2147483647, %v318_v44 }
  0x47   :  { %442 = vsinq.f32 %v120_v26 }
  0x48   :  { %v322_v48 = vmul.f32 %v321_v45, %v319_v50 }
  0x4a   :  { %v323_v57 = vxor.u32 2147483648, %v322_v48 }
  0x4c   :  { %v324_v59 = vsel %vm241_vm0, %v323_v57, %v322_v48 }
  0x4d   :  { %v327_v62 = vsel %vm597_vm1, %v500_v8, %v324_v59 }
  0x4e   :  { %444 = vcosq.f32 %v327_v62 }
  0x4f   :  { %446 = vsinq.f32 %v327_v62 }
  0x50   :  { %448 = vlog2.f32 %v377_v4 }
  0x53   :  { %v441_v13 = vpop.eup %440 }
  0x54   :  { %v443_v2 = vpop.eup %442  ;;  %v131_v3 = vxor.u32 2147483648, %v441_v13 }
  0x55   :  { %v128_v61 = vxor.u32 2147483648, %v443_v2 }
  0x56   :  { %v132_v14 = vsel %vm130_vm2, %v131_v3, %v443_v2  ;;  %v236_v15 = vsel %vm234_vm3, %v131_v3, %v443_v2 }
  0x57   :  { %v129_v16 = vsel %vm127_vm4, %v441_v13, %v128_v61  ;;  %v233_v17 = vsel %vm231_vm5, %v441_v13, %v128_v61 }
  0x58   :  { %v133_v18 = vsel %vm126_vm6, %v129_v16, %v132_v14  ;;  %v237_v19 = vsel %vm230_vm7, %v233_v17, %v236_v15 }
  0x59   :  { %v134_v21 = vsel %vm124_vm8, nan, %v133_v18  ;;  %v238_v22 = vsel %vm124_vm8, nan, %v237_v19 }
  0x5a   :  { %v353_v12 = vmul.f32 %v134_v21, %v490_v5  ;;  %v354_v23 = vmul.f32 %v238_v22, %v497_v7  ;;  %v356_v24 = vmul.f32 %v134_v21, %v497_v7  ;;  %v357_v27 = vmul.f32 %v238_v22, %v490_v5 }
  0x5b   :  { %v445_v28 = vpop.eup %444  ;;  %v369_v7 = vmul.f32 %v439_v0, %v589_v49 }
  0x5c   :  { %v355_v29 = vadd.f32 %v354_v23, %v353_v12  ;;  %v358_v6 = vsub.f32 %v356_v24, %v357_v27  ;;  %v447_v33 = vpop.eup %446  ;;  %v339_v30 = vxor.u32 2147483648, %v445_v28 }
  0x5d   :  { %v336_v35 = vxor.u32 2147483648, %v447_v33  ;;  %v371_v42 = vadd.f32 %v370_v38, %v369_v7  ;;  %v449_v43 = vpop.eup %448 }
  0x5e   :  { %v359_v31 = vmul.f32 %v355_v29, %v355_v29  ;;  %v361_v25 = vmul.f32 %v358_v6, %v358_v6  ;;  %v340_v5 = vsel %vm338_vm9, %v339_v30, %v447_v33  ;;  %v379_v50 = vmul.f32 0.6931472, %v449_v43 }
  0x5f   :  { %v337_v39 = vsel %vm335_vm10, %v445_v28, %v336_v35 }
  0x60   :  { %v360_v36 = vmul.f32 %v437_v55, %v359_v31  ;;  %v362_v37 = vmul.f32 %v439_v0, %v361_v25  ;;  %v341_v41 = vsel %vm334_vm11, %v337_v39, %v340_v5  ;;  %v380_v53 = vmul.f32 -0.5, %v379_v50 }
  0x61   :  { %v342_v9 = vsel %vm331_vm12, nan, %v341_v41 }
  0x62   :  { %v363_v40 = vadd.f32 %v362_v37, %v360_v36  ;;  %v343_v26 = vmul.f32 %v342_v9, %v342_v9 }
  0x64   :  { %v344_v44 = vsub.f32 1.0, %v343_v26  ;;  %v368_v45 = vmul.f32 %v367_v20, %v343_v26  ;;  %v364_v52 = vmul.f32 2.0, %v363_v40 }
  0x66   :  { %v372_v46 = vmul.f32 %v371_v42, %v344_v44 }
  0x68   :  { %v373_v48 = vadd.f32 %v372_v46, %v368_v45 }
  0x6a   :  { %v374_v8 = vmul.f32 0.5, %v373_v48 }
  0x6c   :  { %v381_v54 = vadd.f32 %v374_v8, %v364_v52 }
  0x6e   :  { %v382_v49 = vadd.f32 %v381_v54, %v380_v53 }
  0x70   :  { %v421_v56 = vadd.f32 -1.0, %v382_v49 }
  0x72   :  { %v384_v47 = vmax.f32 %v421_v56, 1e-07 }
  0x74   :  { %450 = vrsqrt.f32 %v384_v47  ;;  %vm387_vm13 = vcmp.eq.f32.partialorder %v384_v47, inf  ;;  %v390_v57 = vand.u32 2147483648, %v384_v47  ;;  %vm389_vm14 = vcmp.eq.f32.partialorder %v384_v47, 0.0 }
  0x81   :  { %v451_v55 = vpop.eup %450 }
  0x82   :  { %v386_v58 = vmul.f32 %v451_v55, %v384_v47 }
  0x84   :  { %v388_v51 = vsel %vm387_vm13, %v384_v47, %v386_v58 }
  0x85   :  { %v391_v59 = vsel %vm389_vm14, %v390_v57, %v388_v51 }
  0x86   :  { %v392_v60 = vadd.f32 1.0, %v391_v59 }
  0x88   :  { %452 = vrcp.f32 %v392_v60 }
  0x95   :  { %v453_v62 = vpop.eup %452 }
  0x96   :  { %v395_v63 = vsub.f32 1.0, %v453_v62 }
  0x98   :  { %396 = vst [vmem:[%s622_s2] sm:$0xff] %v395_v63 }

</bundles_post_ra>
